<compile_context>
chip_gen: v5e
topology: v5e:2x2
jax: 0.10.0
libtpu: 0.0.40
codegen_flags: <defaults>
</compile_context>

<pallas_src>
import functools
import math

import jax
import jax.numpy as jnp
from jax.experimental import pallas as pl
from jax.experimental.pallas import tpu as pltpu


LANE = 128     # lane width: pad hidden/output *compute* dims to multiples of this
SUBLANE = 8    # f32 sublane width: batch tiles are multiples of this


def _round_up(x, m):
    return (x + m - 1) // m * m


def _batch_tile(batch):
    """Pick (tile, padded_batch).

    <=256 rows: one grid step (launch/weight-DMA dominated anyway).
    > 256 rows: at least two grid steps (so v7x's two TensorCores both get work via the
    "parallel" batch axis), tile capped at 512 rows (best measured HBM-roofline fraction,
    and fewer ~0.35us per-grid-step overheads than 256-row tiles).
    """
    b8 = _round_up(batch, SUBLANE)
    if b8 <= 256:
        return b8, b8
    tb = min(512, _round_up((b8 + 1) // 2, SUBLANE))
    return tb, _round_up(b8, tb)


def _mlp_kernel(x_ref, w1_ref, b1_ref, w2_ref, b2_ref, w3_ref, b3_ref, out_ref):
    """Whole MLP hot path on one batch tile: two ReLU-activated matmuls + output matmul.

    All math is f32 (matches nn.Linear semantics; at these shapes f32 MXU cost is immaterial).
    The layer-3 matmul runs lane-dense at a_p (128) inside VMEM; only the real action columns
    are stored to HBM (out_ref is exactly actions_num wide).
    """
    x = x_ref[...]

    # layer1: (TB, D_in) @ (D_in, H1p) + (1, H1p), ReLU.
    h1 = jnp.dot(x, w1_ref[...], preferred_element_type=jnp.float32) + b1_ref[...]
    h1 = jnp.maximum(h1, 0.0)

    # layer2: (TB, H1p) @ (H1p, H2p) + (1, H2p), ReLU.
    h2 = jnp.dot(h1, w2_ref[...], preferred_element_type=jnp.float32) + b2_ref[...]
    h2 = jnp.maximum(h2, 0.0)

    # layer3 (output head, no activation): (TB, H2p) @ (H2p, Ap) + (1, Ap).
    actions = jnp.dot(h2, w3_ref[...], preferred_element_type=jnp.float32) + b3_ref[...]

    # Store only the real action columns (static slice -> narrow masked vst, ~32x fewer bytes
    # than writing the 128-padded slab).
    n_act = out_ref.shape[1]
    out_ref[...] = actions[:, :n_act].astype(out_ref.dtype)


@functools.partial(jax.jit, static_argnames=("actions_num",))
def deep_q_network_forward(state, params, actions_num):
    """Runs the DeepQNetwork forward pass with a single Pallas call.

    state:       (B, D_in) float32
    params:      dict with f32 weights w1 (D_in, H1p), w2 (H1p, H2p), w3 (H2p, Ap) and
                 f32 biases b1 (1, H1p), b2 (1, H2p), b3 (1, Ap); hidden/output dims padded to 128.
    actions_num: true (unpadded) number of actions.
    returns actions: (B, actions_num) float32
    """
    w1, b1 = params["w1"], params["b1"]
    w2, b2 = params["w2"], params["b2"]
    w3, b3 = params["w3"], params["b3"]

    batch, d_in = state.shape
    h1p = w1.shape[1]
    h2p = w2.shape[1]
    a_p = w3.shape[1]

    tb, batch_pad = _batch_tile(batch)
    if batch_pad != batch:
        state = jnp.pad(state, ((0, batch_pad - batch), (0, 0)))
    grid = (batch_pad // tb,)

    # Batch-tiled state/output; weights and biases use a constant index_map so they are fetched
    # once and stay resident in VMEM across every grid step.
    state_spec = pl.BlockSpec((tb, d_in), lambda i: (i, 0))
    out_spec = pl.BlockSpec((tb, actions_num), lambda i: (i, 0))
    resident = lambda shape: pl.BlockSpec(shape, lambda i: (0, 0))

    # Advisory cost estimate for XLA's scheduler.
    flops = 2 * batch_pad * (d_in * h1p + h1p * h2p + h2p * a_p)
    weight_bytes = sum(t.size * t.dtype.itemsize for t in (w1, b1, w2, b2, w3, b3))
    bytes_accessed = (
        state.size * state.dtype.itemsize + weight_bytes + batch_pad * actions_num * 4
    )

    # Explicit scoped-VMEM budget: double-buffered in/out tiles + (conservatively double-buffered)
    # resident weights + f32 activation intermediates, with 2x headroom.  Floors/caps keep it above
    # v5e's 16 MiB default and under v7x's 64 MiB physical VMEM.
    vmem_budget = (
        2 * tb * (d_in + actions_num) * 4
        + 2 * weight_bytes
        + 2 * tb * (h1p + h2p + a_p) * 4
    )
    vmem_limit = int(min(max(2 * vmem_budget, 32 << 20), 64 << 20))

    out = pl.pallas_call(
        _mlp_kernel,
        out_shape=jax.ShapeDtypeStruct((batch_pad, actions_num), jnp.float32),
        grid=grid,
        in_specs=[
            state_spec,
            resident(w1.shape), resident(b1.shape),
            resident(w2.shape), resident(b2.shape),
            resident(w3.shape), resident(b3.shape),
        ],
        out_specs=out_spec,
        compiler_params=pltpu.CompilerParams(
            dimension_semantics=("parallel",),  # v7x: shard batch tiles across both TensorCores
            vmem_limit_bytes=vmem_limit,
        ),
        cost_estimate=pl.CostEstimate(
            flops=flops, transcendentals=0, bytes_accessed=bytes_accessed
        ),
    )(state, w1, b1, w2, b2, w3, b3)

    if batch_pad != batch:
        out = out[:batch]
    return out


def init_params(key, input_dim, layer1_size, layer2_size, actions_num):
    """Init matching nn.Linear's default U(-1/sqrt(fan_in), 1/sqrt(fan_in)).

    Weights are stored transposed ((in, out)) and zero-padded along hidden/output feature dims to
    multiples of 128 for lane-dense vregs.  The input (K) dim of layer 1 is NOT padded (padding it
    would 16x the state DMA for zero MXU benefit).  Padded rows/columns are zero, so they are
    inert through matmul + ReLU.  Everything is f32 to match nn.Linear semantics exactly.
    """
    h1p = _round_up(layer1_size, LANE)
    h2p = _round_up(layer2_size, LANE)
    a_p = _round_up(actions_num, LANE)

    def linear(key, fan_in, fan_out, fan_in_pad, fan_out_pad):
        kw, kb = jax.random.split(key)
        bound = 1.0 / math.sqrt(fan_in)
        w = jax.random.uniform(kw, (fan_in, fan_out), jnp.float32, -bound, bound)
        b = jax.random.uniform(kb, (1, fan_out), jnp.float32, -bound, bound)
        w = jnp.pad(w, ((0, fan_in_pad - fan_in), (0, fan_out_pad - fan_out)))
        b = jnp.pad(b, ((0, 0), (0, fan_out_pad - fan_out)))
        return w, b

    k1, k2, k3 = jax.random.split(key, 3)
    w1, b1 = linear(k1, input_dim, layer1_size, input_dim, h1p)
    w2, b2 = linear(k2, layer1_size, layer2_size, h1p, h2p)
    w3, b3 = linear(k3, layer2_size, actions_num, h2p, a_p)
    return {"w1": w1, "b1": b1, "w2": w2, "b2": b2, "w3": w3, "b3": b3}


def _reference_forward(state, params, actions_num):
    """Pure-JAX reference with the module's f32 semantics."""
    f1 = jnp.maximum(state @ params["w1"] + params["b1"], 0.0)
    f2 = jnp.maximum(f1 @ params["w2"] + params["b2"], 0.0)
    return (f2 @ params["w3"] + params["b3"])[:, :actions_num]


if __name__ == "__main__":
    # Small shapes consistent with the module: input_dims=(8,), fc1=32, fc2=32, actions=4.
    input_dim = 8
    layer1_size = 32
    layer2_size = 32
    actions_num = 4

    key = jax.random.PRNGKey(0)
    k_params, k_state_small, k_state_big = jax.random.split(key, 3)

    params = init_params(k_params, input_dim, layer1_size, layer2_size, actions_num)

    # Case 1: tiny batch (typical DQN action selection) -> single grid step.
    state_small = jax.random.normal(k_state_small, (2, input_dim), jnp.float32)
    actions_small = deep_q_network_forward(state_small, params, actions_num)
    jax.block_until_ready(actions_small)
    assert actions_small.shape == (2, actions_num)
    ref_small = _reference_forward(state_small, params, actions_num)
    assert jnp.allclose(actions_small, ref_small, atol=1e-3, rtol=1e-3)

    # Case 2: larger batch (replay-buffer style) -> row padding + >=2 grid steps (v7x megacore path).
    state_big = jax.random.normal(k_state_big, (300, input_dim), jnp.float32)
    actions_big = deep_q_network_forward(state_big, params, actions_num)
    jax.block_until_ready(actions_big)
    assert actions_big.shape == (300, actions_num)
    ref_big = _reference_forward(state_big, params, actions_num)
    assert jnp.allclose(actions_big, ref_big, atol=1e-3, rtol=1e-3)

    print("KERNEL_OK")
</pallas_src>

<mosaic_0001>
module attributes {stable_mosaic.version = 11 : i64} {
  func.func @_mlp_kernel(%arg0: i32, %arg1: memref<8x8xf32, #tpu.memory_space<vmem>>, %arg2: memref<8x128xf32, #tpu.memory_space<vmem>>, %arg3: memref<1x128xf32, #tpu.memory_space<vmem>>, %arg4: memref<128x128xf32, #tpu.memory_space<vmem>>, %arg5: memref<1x128xf32, #tpu.memory_space<vmem>>, %arg6: memref<128x128xf32, #tpu.memory_space<vmem>>, %arg7: memref<1x128xf32, #tpu.memory_space<vmem>>, %arg8: memref<8x4xf32, #tpu.memory_space<vmem>>) attributes {dimension_semantics = [#tpu.dimension_semantics<parallel>], iteration_bounds = array<i64: 1>, scalar_prefetch = 0 : i64, scratch_operands = 0 : i64, tpu.core_type = #tpu.core_type<tc>, window_params = [{transform_indices = @transform_0, window_bounds = array<i64: 8, 8>}, {pipeline_mode = #tpu.pipeline_mode<synchronous>, transform_indices = @transform_1, window_bounds = array<i64: 8, 128>}, {pipeline_mode = #tpu.pipeline_mode<synchronous>, transform_indices = @transform_2, window_bounds = array<i64: 1, 128>}, {pipeline_mode = #tpu.pipeline_mode<synchronous>, transform_indices = @transform_3, window_bounds = array<i64: 128, 128>}, {pipeline_mode = #tpu.pipeline_mode<synchronous>, transform_indices = @transform_4, window_bounds = array<i64: 1, 128>}, {pipeline_mode = #tpu.pipeline_mode<synchronous>, transform_indices = @transform_5, window_bounds = array<i64: 128, 128>}, {pipeline_mode = #tpu.pipeline_mode<synchronous>, transform_indices = @transform_6, window_bounds = array<i64: 1, 128>}, {transform_indices = @transform_7, window_bounds = array<i64: 8, 4>}]} {
    %c0 = arith.constant 0 : index
    %c0_0 = arith.constant 0 : index
    %0 = vector.load %arg1[%c0, %c0_0] : memref<8x8xf32, #tpu.memory_space<vmem>>, vector<8x8xf32>
    %c0_1 = arith.constant 0 : index
    %c0_2 = arith.constant 0 : index
    %1 = vector.load %arg2[%c0_1, %c0_2] : memref<8x128xf32, #tpu.memory_space<vmem>>, vector<8x128xf32>
    %cst = arith.constant dense<0.000000e+00> : vector<8x128xf32>
    %2 = tpu.matmul %0, %1, %cst {dimension_numbers = #tpu.dot_dimension_numbers<[1], [0], [0], [1], [0, 0, 1, 1], [], []>} : vector<8x8xf32>, vector<8x128xf32>, vector<8x128xf32> -> vector<8x128xf32>
    %c0_3 = arith.constant 0 : index
    %c0_4 = arith.constant 0 : index
    %3 = vector.load %arg3[%c0_3, %c0_4] : memref<1x128xf32, #tpu.memory_space<vmem>>, vector<1x128xf32>
    %4 = vector.broadcast %3 : vector<1x128xf32> to vector<8x128xf32>
    %5 = arith.addf %2, %4 : vector<8x128xf32>
    %cst_5 = arith.constant 0.000000e+00 : f32
    %6 = vector.broadcast %cst_5 : f32 to vector<8x128xf32>
    %7 = arith.maximumf %5, %6 : vector<8x128xf32>
    %c0_6 = arith.constant 0 : index
    %c0_7 = arith.constant 0 : index
    %8 = vector.load %arg4[%c0_6, %c0_7] : memref<128x128xf32, #tpu.memory_space<vmem>>, vector<128x128xf32>
    %cst_8 = arith.constant dense<0.000000e+00> : vector<8x128xf32>
    %9 = tpu.matmul %7, %8, %cst_8 {dimension_numbers = #tpu.dot_dimension_numbers<[1], [0], [0], [1], [0, 0, 1, 1], [], []>} : vector<8x128xf32>, vector<128x128xf32>, vector<8x128xf32> -> vector<8x128xf32>
    %c0_9 = arith.constant 0 : index
    %c0_10 = arith.constant 0 : index
    %10 = vector.load %arg5[%c0_9, %c0_10] : memref<1x128xf32, #tpu.memory_space<vmem>>, vector<1x128xf32>
    %11 = vector.broadcast %10 : vector<1x128xf32> to vector<8x128xf32>
    %12 = arith.addf %9, %11 : vector<8x128xf32>
    %cst_11 = arith.constant 0.000000e+00 : f32
    %13 = vector.broadcast %cst_11 : f32 to vector<8x128xf32>
    %14 = arith.maximumf %12, %13 : vector<8x128xf32>
    %c0_12 = arith.constant 0 : index
    %c0_13 = arith.constant 0 : index
    %15 = vector.load %arg6[%c0_12, %c0_13] : memref<128x128xf32, #tpu.memory_space<vmem>>, vector<128x128xf32>
    %cst_14 = arith.constant dense<0.000000e+00> : vector<8x128xf32>
    %16 = tpu.matmul %14, %15, %cst_14 {dimension_numbers = #tpu.dot_dimension_numbers<[1], [0], [0], [1], [0, 0, 1, 1], [], []>} : vector<8x128xf32>, vector<128x128xf32>, vector<8x128xf32> -> vector<8x128xf32>
    %c0_15 = arith.constant 0 : index
    %c0_16 = arith.constant 0 : index
    %17 = vector.load %arg7[%c0_15, %c0_16] : memref<1x128xf32, #tpu.memory_space<vmem>>, vector<1x128xf32>
    %18 = vector.broadcast %17 : vector<1x128xf32> to vector<8x128xf32>
    %19 = arith.addf %16, %18 : vector<8x128xf32>
    %20 = vector.extract_strided_slice %19 {offsets = [0, 0], sizes = [8, 4], strides = [1, 1]} : vector<8x128xf32> to vector<8x4xf32>
    %c0_17 = arith.constant 0 : index
    %c0_18 = arith.constant 0 : index
    %21 = vector.load %arg8[%c0_17, %c0_18] : memref<8x4xf32, #tpu.memory_space<vmem>>, vector<8x4xf32>
    tpu.vector_store %arg8[%c0_17, %c0_18], %20 {strides = array<i32>} : memref<8x4xf32, #tpu.memory_space<vmem>>, vector<8x4xf32>,
    return
  }
  func.func @transform_0(%arg0: i32) -> (i32, i32) {
    %c0_i32 = arith.constant 0 : i32
    %c0_i32_0 = arith.constant 0 : i32
    return %arg0, %c0_i32 : i32, i32
  }
  func.func @transform_1(%arg0: i32) -> (i32, i32) {
    %c0_i32 = arith.constant 0 : i32
    %c0_i32_0 = arith.constant 0 : i32
    %c0_i32_1 = arith.constant 0 : i32
    return %c0_i32, %c0_i32_0 : i32, i32
  }
  func.func @transform_2(%arg0: i32) -> (i32, i32) {
    %c0_i32 = arith.constant 0 : i32
    %c0_i32_0 = arith.constant 0 : i32
    %c0_i32_1 = arith.constant 0 : i32
    return %c0_i32, %c0_i32_0 : i32, i32
  }
  func.func @transform_3(%arg0: i32) -> (i32, i32) {
    %c0_i32 = arith.constant 0 : i32
    %c0_i32_0 = arith.constant 0 : i32
    %c0_i32_1 = arith.constant 0 : i32
    return %c0_i32, %c0_i32_0 : i32, i32
  }
  func.func @transform_4(%arg0: i32) -> (i32, i32) {
    %c0_i32 = arith.constant 0 : i32
    %c0_i32_0 = arith.constant 0 : i32
    %c0_i32_1 = arith.constant 0 : i32
    return %c0_i32, %c0_i32_0 : i32, i32
  }
  func.func @transform_5(%arg0: i32) -> (i32, i32) {
    %c0_i32 = arith.constant 0 : i32
    %c0_i32_0 = arith.constant 0 : i32
    %c0_i32_1 = arith.constant 0 : i32
    return %c0_i32, %c0_i32_0 : i32, i32
  }
  func.func @transform_6(%arg0: i32) -> (i32, i32) {
    %c0_i32 = arith.constant 0 : i32
    %c0_i32_0 = arith.constant 0 : i32
    %c0_i32_1 = arith.constant 0 : i32
    return %c0_i32, %c0_i32_0 : i32, i32
  }
  func.func @transform_7(%arg0: i32) -> (i32, i32) {
    %c0_i32 = arith.constant 0 : i32
    %c0_i32_0 = arith.constant 0 : i32
    return %arg0, %c0_i32 : i32, i32
  }
}

</mosaic_0001>

<bundles_post_ra>
// kernel: deep_q_network_forward.1
= control target key start
LH: loop header
LB: loop body
LE: loop exit
PB: predicated region body
PF: predicated region fallthrough
CT: control target
= control target key end

     0   :  { %12 = vsyncpa [#allocation3], 0  ;;  %s306_s0 = inlined_call_operand.vmem [shape: f32[8,8], index: 0, kind: input, shape index: {}]   ;;  %s307_s1 = inlined_call_operand.vmem [shape: f32[8,128], index: 1, kind: input, shape index: {}]   ;;  %s308_s2 = inlined_call_operand.vmem [shape: f32[1,128], index: 2, kind: input, shape index: {}]   ;;  %s309_s3 = inlined_call_operand.hbm [shape: f32[128,128], index: 3, kind: input, shape index: {}]   ;;  %s310_s4 = inlined_call_operand.vmem [shape: f32[1,128], index: 4, kind: input, shape index: {}]   ;;  %s311_s5 = inlined_call_operand.hbm [shape: f32[128,128], index: 5, kind: input, shape index: {}]   ;;  %s312_s6 = inlined_call_operand.vmem [shape: f32[1,128], index: 6, kind: input, shape index: {}]   ;;  %s313_s7 = inlined_call_operand.vmem [shape: f32[8,4], index: 7, kind: output, shape index: {}]  }
   0x1   :  { %s24_s26 = sshll.u32 %s309_s3, 4  ;;  %s25_s26 = int_to_ptr.hbm [resolvable:$true] %s24_s26 }
   0x2   :  { %13 = vsyncpa [#allocation5], 0  ;;  %s238_s27 = smov [#allocation2]   ;;  %s39_s8 = sshll.u32 %s311_s5, 4  ;;  %s40_s8 = int_to_ptr.hbm [resolvable:$true] %s39_s8 }
   0x3   :  { %s26_s28 = sshll.u32 %s238_s27, 4  ;;  %s239_s9 = smov 128   ;;  %s27_s28 = int_to_ptr.vmem [resolvable:$true] %s26_s28 }
   0x4   :  { %s240_s10 = smov 8   ;;  %s241_s11 = smov [#allocation4]  }
   0x5   :  { %32 = dma.hbm_to_vmem [thread:$0]  %s25_s26, 2048, %s27_s28, [#allocation3], %s239_s9, %s239_s9, %s240_s10  }
   0x6   :  { %s41_s12 = sshll.u32 %s241_s11, 4  ;;  %s42_s12 = int_to_ptr.vmem [resolvable:$true] %s41_s12 }
   0x7   :  { %47 = dma.hbm_to_vmem [thread:$0]  %s40_s8, 2048, %s42_s12, [#allocation5], %s239_s9, %s239_s9, %s240_s10  }
   0x8   :  { %234 = dma.done.wait [#allocation3], 2048  }
   0x9   :  { %235 = vsyncadd [#allocation3], 4294965248 }
   0xa   :  { %236 = dma.done.wait [#allocation5], 2048  }
   0xb   :  { %237 = vsyncadd [#allocation5], 4294965248  ;;  %vm64_vm0 = vcmask 64512   ;;  %v59_v0 = vld [vmem:[%s307_s1] sm:$0xff]  ;;  %v104_v2 = vld [vmem:[#allocation2 + $0x78] sm:$0xff]  ;;  %vm170_vm1 = vcmask 31744  }
   0xc   :  { %v58_v1 = vld [vmem:[%s306_s0] sm:$0xff]  ;;  %83 = vmatpush.msra.mxu0 %v59_v0  ;;  %109 = vmatpush.msra.mxu1 %v104_v2  ;;  %v103_v3 = vld [vmem:[#allocation2 + $0x70] sm:$0xff]  ;;  %v102_v4 = vld [vmem:[#allocation2 + $0x68] sm:$0xff] }
   0xd   :  { %178 = vmatmul.msk.f32.vlgmr.msra.gmra.mxu0 %vm64_vm0, %v58_v1  ;;  %v101_v5 = vld [vmem:[#allocation2 + $0x60] sm:$0xff]  ;;  %v100_v6 = vld [vmem:[#allocation2 + $0x58] sm:$0xff]  ;;  %v99_v7 = vld [vmem:[#allocation2 + $0x50] sm:$0xff] }
   0xe   :  { %110 = vmatpush.msra.mxu1 %v103_v3  ;;  %v98_v8 = vld [vmem:[#allocation2 + $0x48] sm:$0xff]  ;;  %v97_v9 = vld [vmem:[#allocation2 + $0x40] sm:$0xff]  ;;  %v96_v10 = vld [vmem:[#allocation2 + $0x38] sm:$0xff] }
   0xf   :  { %v95_v11 = vld [vmem:[#allocation2 + $0x30] sm:$0xff]  ;;  %v94_v12 = vld [vmem:[#allocation2 + $0x28] sm:$0xff]  ;;  %v93_v13 = vld [vmem:[#allocation2 + $0x20] sm:$0xff] }
  0x10   :  { %111 = vmatpush.msra.mxu1 %v102_v4  ;;  %v92_v14 = vld [vmem:[#allocation2 + $0x18] sm:$0xff]  ;;  %v91_v15 = vld [vmem:[#allocation2 + $0x10] sm:$0xff]  ;;  %v90_v16 = vld [vmem:[#allocation2 + $0x8] sm:$0xff] }
  0x11   :  { %v89_v17 = vld [vmem:[#allocation2] sm:$0xff]  ;;  %v145_v18 = vld [vmem:[#allocation4 + $0x78] sm:$0xff]  ;;  %v144_v19 = vld [vmem:[#allocation4 + $0x70] sm:$0xff] }
  0x12   :  { %112 = vmatpush.msra.mxu1 %v101_v5  ;;  %150 = vmatpush.msra.mxu2 %v145_v18  ;;  %v143_v20 = vld [vmem:[#allocation4 + $0x68] sm:$0xff]  ;;  %v142_v21 = vld [vmem:[#allocation4 + $0x60] sm:$0xff]  ;;  %v141_v22 = vld [vmem:[#allocation4 + $0x58] sm:$0xff] }
  0x13   :  { %v140_v23 = vld [vmem:[#allocation4 + $0x50] sm:$0xff]  ;;  %v139_v24 = vld [vmem:[#allocation4 + $0x48] sm:$0xff]  ;;  %v138_v25 = vld [vmem:[#allocation4 + $0x40] sm:$0xff] }
  0x14   :  { %113 = vmatpush.msra.mxu1 %v100_v6  ;;  %151 = vmatpush.msra.mxu2 %v144_v19  ;;  %v137_v26 = vld [vmem:[#allocation4 + $0x38] sm:$0xff]  ;;  %v136_v27 = vld [vmem:[#allocation4 + $0x30] sm:$0xff]  ;;  %v135_v28 = vld [vmem:[#allocation4 + $0x28] sm:$0xff] }
  0x15   :  { %v134_v29 = vld [vmem:[#allocation4 + $0x20] sm:$0xff]  ;;  %v133_v30 = vld [vmem:[#allocation4 + $0x18] sm:$0xff]  ;;  %v132_v35 = vld [vmem:[#allocation4 + $0x10] sm:$0xff] }
  0x16   :  { %114 = vmatpush.msra.mxu1 %v99_v7  ;;  %152 = vmatpush.msra.mxu2 %v143_v20  ;;  %v183_v31 = vld [vmem:[%s308_s2] ss:$0 sm:$0xff]  ;;  %v131_v36 = vld [vmem:[#allocation4 + $0x8] sm:$0xff] }
  0x17   :  { %v130_v37 = vld [vmem:[#allocation4] sm:$0xff] }
  0x18   :  { %115 = vmatpush.msra.mxu1 %v98_v8  ;;  %153 = vmatpush.msra.mxu2 %v142_v21  ;;  %v184_v38 = vld [vmem:[%s310_s4] ss:$0 sm:$0xff] }
  0x19   :  { %v185_v42 = vld [vmem:[%s312_s6] ss:$0 sm:$0xff] }
  0x1a   :  { %116 = vmatpush.msra.mxu1 %v97_v9  ;;  %154 = vmatpush.msra.mxu2 %v141_v22 }
  0x1c   :  { %117 = vmatpush.msra.mxu1 %v96_v10  ;;  %155 = vmatpush.msra.mxu2 %v140_v23 }
  0x1e   :  { %118 = vmatpush.msra.mxu1 %v95_v11  ;;  %156 = vmatpush.msra.mxu2 %v139_v24 }
  0x20   :  { %119 = vmatpush.msra.mxu1 %v94_v12  ;;  %157 = vmatpush.msra.mxu2 %v138_v25 }
  0x22   :  { %120 = vmatpush.msra.mxu1 %v93_v13  ;;  %158 = vmatpush.msra.mxu2 %v137_v26 }
  0x24   :  { %121 = vmatpush.msra.mxu1 %v92_v14  ;;  %159 = vmatpush.msra.mxu2 %v136_v27 }
  0x26   :  { %122 = vmatpush.msra.mxu1 %v91_v15  ;;  %160 = vmatpush.msra.mxu2 %v135_v28 }
  0x28   :  { %123 = vmatpush.msra.mxu1 %v90_v16  ;;  %161 = vmatpush.msra.mxu2 %v134_v29 }
  0x2a   :  { %124 = vmatpush.msra.mxu1 %v89_v17  ;;  %162 = vmatpush.msra.mxu2 %v133_v30 }
  0x2c   :  { %163 = vmatpush.msra.mxu2 %v132_v35 }
  0x2e   :  { %164 = vmatpush.msra.mxu2 %v131_v36 }
  0x30   :  { %165 = vmatpush.msra.mxu2 %v130_v37 }
  0x8a   :  { %v85_v32 = vpop.f32.mrf.mxu0 }
  0x8b   :  { %v86_v33 = vadd.f32 %v183_v31, %v85_v32 }
  0x8d   :  { %v88_v34 = vmax.f32 %v86_v33, 0.0 }
  0x8f   :  { %125 = vmatmul.f32.vlgmr.msra.gmra.mxu1 %v88_v34 }
 0x10c   :  { %v126_v39 = vpop.f32.mrf.mxu1 }
 0x10d   :  { %v127_v40 = vadd.f32 %v184_v38, %v126_v39 }
 0x10f   :  { %v129_v41 = vmax.f32 %v127_v40, 0.0 }
 0x111   :  { %166 = vmatmul.f32.vlgmr.msra.gmra.mxu2 %v129_v41 }
 0x194   :  { %v167_v43 = vpop.f32.mrf.mxu2 }
 0x195   :  { %v168_v44 = vadd.f32 %v185_v42, %v167_v43 }
 0x197   :  { %171 = vst.msk [vmem:[%s313_s7] sm:$0xff] %vm170_vm1, %v168_v44 }
 0x198   :  { %176 = vsyncpa [#allocation3], 1 }
 0x199   :  { %177 = vsyncpa [#allocation5], 1 }

</bundles_post_ra>
